<compile_context>
chip_gen: v5e
topology: v5e:2x2
jax: 0.10.0
libtpu: 0.0.40
codegen_flags: <defaults>
</compile_context>

<pallas_src>
import functools

import numpy as np
import jax
import jax.numpy as jnp
from jax import lax
from jax.experimental import pallas as pl
from jax.experimental.pallas import tpu as pltpu


_VMEM = pl.BlockSpec(memory_space=pltpu.MemorySpace.VMEM)


# ------------------------------ fused kernel --------------------------------

def _critic_kernel(xt_ref, act_ref,
                   w1_ref, b1_ref, w2_ref, b2_ref,
                   fcw_ref, fcb_ref, ln_g_ref, ln_b_ref,
                   qw1f_ref, qw1a_ref, qb1_ref,
                   qw2_ref, qb2_ref, qw3_ref, qb3_ref,
                   out_ref, *, bsz, oh2):
    """Entire Critic forward in one kernel.

    Row layout of all conv-stage activations is r-major / batch-minor
    (row = r*B + b), so every slice below is contiguous and static.
    """
    f32 = jnp.float32

    # conv1: ONE batched MXU matmul.  kh is fused densely along K (wrapper
    # row-im2col), kw is banded inside w1.  Bias added once.
    h1 = jnp.dot(xt_ref[...].astype(w1_ref.dtype), w1_ref[...],
                 preferred_element_type=f32)
    h1 = jnp.maximum(h1 + b1_ref[...], 0.0)              # (OH1*B, OW1*NF)

    # conv2: the 3 kh taps are contiguous row slices in the r-major layout;
    # fuse them along K with one lane concat, then ONE batched matmul.
    rows = oh2 * bsz
    t2 = jnp.concatenate(
        [h1[dr * bsz: dr * bsz + rows, :] for dr in range(3)], axis=1)
    h2 = jnp.dot(t2.astype(w2_ref.dtype), w2_ref[...],
                 preferred_element_type=f32)
    h2 = jnp.maximum(h2 + b2_ref[...], 0.0)               # (OH2*B, OW2*NF)

    # flatten: contiguous (B, OW2*NF) row slabs lane-concatenated in r order
    # -> (B, OH2*OW2*NF), then ONE fc matmul for the whole batch.
    flat = jnp.concatenate(
        [h2[r * bsz:(r + 1) * bsz, :] for r in range(oh2)], axis=1)
    y = jnp.dot(flat.astype(fcw_ref.dtype), fcw_ref[...],
                preferred_element_type=f32) + fcb_ref[...]   # (B, FEAT)

    # LayerNorm (affine, eps=1e-5) in f32.
    mu = jnp.mean(y, axis=-1, keepdims=True)
    var = jnp.mean((y - mu) ** 2, axis=-1, keepdims=True)
    feat = (y - mu) * lax.rsqrt(var + 1e-5) * ln_g_ref[...] + ln_b_ref[...]

    # Both Q heads, merged.  torch.cat([feat, action]) @ W1.T is split into
    # feat @ W1f + action @ W1a; layers 2/3 are block-diagonal over the heads.
    h = jnp.dot(feat.astype(qw1f_ref.dtype), qw1f_ref[...],
                preferred_element_type=f32)
    h = h + jnp.dot(act_ref[...].astype(qw1a_ref.dtype), qw1a_ref[...],
                    preferred_element_type=f32)
    h = jnp.maximum(h + qb1_ref[...], 0.0)                 # (B, 2*HID)
    h = jnp.maximum(
        jnp.dot(h.astype(qw2_ref.dtype), qw2_ref[...],
                preferred_element_type=f32) + qb2_ref[...], 0.0)
    out_ref[...] = (jnp.dot(h.astype(qw3_ref.dtype), qw3_ref[...],
                            preferred_element_type=f32)
                    + qb3_ref[...])                        # (B, 2) = q1 | q2


# ------------------------------- wrapper ------------------------------------

def critic_forward(packed, obs, action):
    """obs: (B, C, H, W) float32 in [0, 255]; action: (B, A).  Returns (q1, q2)."""
    B, C, H, W = obs.shape
    assert H >= 5 and W >= 5, "need at least 5x5 input for conv1(s2)+conv2(s1)"
    OH1, OW1 = (H - 3) // 2 + 1, (W - 3) // 2 + 1
    OH2 = OH1 - 2

    # Wrapper-side row-im2col for conv1 (touches the raw input exactly once):
    # rows are (r1, b) r-major, lanes are (kh, w, c) with the 3 kh taps fused
    # along K so conv1 is a single matmul in the kernel.
    x = jnp.transpose(obs, (0, 2, 3, 1)).astype(jnp.float32)      # (B, H, W, C)
    taps = []
    for kh in range(3):
        t = x[:, kh: kh + 2 * (OH1 - 1) + 1: 2, :, :]             # (B, OH1, W, C)
        t = jnp.transpose(t, (1, 0, 2, 3)).reshape(OH1 * B, W * C)  # r-major rows
        taps.append(t)
    x_taps = jnp.concatenate(taps, axis=1)                         # (OH1*B, 3*W*C)

    q = pl.pallas_call(
        functools.partial(_critic_kernel, bsz=B, oh2=OH2),
        out_shape=jax.ShapeDtypeStruct((B, 2), jnp.float32),
        in_specs=[_VMEM] * 17,
        out_specs=_VMEM,
    )(x_taps, action.astype(jnp.float32),
      packed["w1big"], packed["b1big"], packed["w2big"], packed["b2big"],
      packed["fcw"], packed["fcb"], packed["ln_g"], packed["ln_b"],
      packed["qw1f"], packed["qw1a"], packed["qb1"],
      packed["qw2"], packed["qb2"], packed["qw3"], packed["qb3"])
    # TODO(synk): detach_encoder only affects gradients (tensor.detach()); the
    # self.outputs dict / log() are training-time bookkeeping — not translated.
    return q[:, 0:1], q[:, 1:2]


# -------------------------- parameter init / prepack -------------------------

def _orthogonal(rng, out_d, in_d):
    """nn.init.orthogonal_ semantics; returned in torch (out, in) layout."""
    a = rng.standard_normal((max(out_d, in_d), min(out_d, in_d)))
    q, r = np.linalg.qr(a)
    q = q * np.sign(np.diag(r))
    if out_d < in_d:
        q = q.T
    return np.ascontiguousarray(q[:out_d, :in_d]).astype(np.float32)


def init_params(obs_shape, action_dim, hidden_dim, feature_dim, num_filters, seed=0):
    """Parameters in PyTorch layouts (OIHW conv weights, (out, in) Linear)."""
    c, h, w = obs_shape
    rng = np.random.default_rng(seed)
    oh1, ow1 = (h - 3) // 2 + 1, (w - 3) // 2 + 1
    oh2, ow2 = oh1 - 2, ow1 - 2
    flat = num_filters * oh2 * ow2

    def conv(co, ci):
        return (rng.standard_normal((co, ci, 3, 3)) / np.sqrt(9 * ci)).astype(np.float32)

    def qfunc(in_dim):
        return {
            "w1": _orthogonal(rng, hidden_dim, in_dim), "b1": np.zeros(hidden_dim, np.float32),
            "w2": _orthogonal(rng, hidden_dim, hidden_dim), "b2": np.zeros(hidden_dim, np.float32),
            "w3": _orthogonal(rng, 1, hidden_dim), "b3": np.zeros(1, np.float32),
        }

    q1, q2 = qfunc(feature_dim + action_dim), qfunc(feature_dim + action_dim)
    return {
        "conv1_w": conv(num_filters, c), "conv1_b": (0.1 * rng.standard_normal(num_filters)).astype(np.float32),
        "conv2_w": conv(num_filters, num_filters), "conv2_b": (0.1 * rng.standard_normal(num_filters)).astype(np.float32),
        "fc_w": _orthogonal(rng, feature_dim, flat), "fc_b": np.zeros(feature_dim, np.float32),
        "ln_g": np.ones(feature_dim, np.float32), "ln_b": np.zeros(feature_dim, np.float32),
        "q1_w1": q1["w1"], "q1_b1": q1["b1"], "q1_w2": q1["w2"], "q1_b2": q1["b2"], "q1_w3": q1["w3"], "q1_b3": q1["b3"],
        "q2_w1": q2["w1"], "q2_b1": q2["b1"], "q2_w2": q2["w2"], "q2_b2": q2["b2"], "q2_w3": q2["w3"], "q2_b3": q2["b3"],
    }


def prepack_params(p, obs_shape):
    """PyTorch layout -> Pallas-friendly packed layout (run once, off hot path).

    On v6e/v7x at production sizes, cast the packed weights to bf16 here
    (keep the numerical-check tolerance looser in that case).
    """
    c, h, w = obs_shape
    nf = p["conv1_w"].shape[0]
    oh1, ow1 = (h - 3) // 2 + 1, (w - 3) // 2 + 1
    oh2, ow2 = oh1 - 2, ow1 - 2
    feat = p["fc_w"].shape[0]
    hid = p["q1_w1"].shape[0]

    # conv1: OIHW -> (kh, kw, ci, co); kh fused densely along K, kw banded.
    # Also fold the obs/255 preprocessing into the weights.
    w1 = np.transpose(np.asarray(p["conv1_w"]), (2, 3, 1, 0))      # (3,3,C,NF)
    w1big = np.zeros((3 * w * c, ow1 * nf), np.float32)
    for kh in range(3):
        for c1 in range(ow1):
            for kw in range(3):
                iw = 2 * c1 + kw
                w1big[kh * w * c + iw * c: kh * w * c + (iw + 1) * c,
                      c1 * nf:(c1 + 1) * nf] = w1[kh, kw]
    w1big *= np.float32(1.0 / 255.0)
    b1big = np.tile(np.asarray(p["conv1_b"]), ow1)[None, :]

    # conv2 (stride 1): same kh-fused / kw-banded structure, K = 3*OW1*NF.
    w2 = np.transpose(np.asarray(p["conv2_w"]), (2, 3, 1, 0))      # (3,3,NF,NF)
    w2big = np.zeros((3 * ow1 * nf, ow2 * nf), np.float32)
    for dr in range(3):
        for c2 in range(ow2):
            for dc in range(3):
                c1 = c2 + dc
                w2big[dr * ow1 * nf + c1 * nf: dr * ow1 * nf + (c1 + 1) * nf,
                      c2 * nf:(c2 + 1) * nf] = w2[dr, dc]
    b2big = np.tile(np.asarray(p["conv2_b"]), ow2)[None, :]

    # fc: PyTorch flattens NCHW (f, r2, c2); kernel lane order is (r2, c2, f).
    fcw = np.asarray(p["fc_w"]).reshape(feat, nf, oh2, ow2)
    fcw = fcw.transpose(2, 3, 1, 0).reshape(oh2 * ow2 * nf, feat).copy()
    fcb = np.asarray(p["fc_b"])[None, :]

    # merged Q heads: layer-1 split into feat/action parts and concatenated
    # along the output axis; layers 2/3 block-diagonal.
    q1w1, q2w1 = np.asarray(p["q1_w1"]), np.asarray(p["q2_w1"])
    qw1f = np.concatenate([q1w1[:, :feat].T, q2w1[:, :feat].T], axis=1)
    qw1a = np.concatenate([q1w1[:, feat:].T, q2w1[:, feat:].T], axis=1)
    qb1 = np.concatenate([p["q1_b1"], p["q2_b1"]])[None, :]
    qw2 = np.zeros((2 * hid, 2 * hid), np.float32)
    qw2[:hid, :hid] = np.asarray(p["q1_w2"]).T
    qw2[hid:, hid:] = np.asarray(p["q2_w2"]).T
    qb2 = np.concatenate([p["q1_b2"], p["q2_b2"]])[None, :]
    qw3 = np.zeros((2 * hid, 2), np.float32)
    qw3[:hid, 0] = np.asarray(p["q1_w3"])[0]
    qw3[hid:, 1] = np.asarray(p["q2_w3"])[0]
    qb3 = np.array([[p["q1_b3"][0], p["q2_b3"][0]]], np.float32)

    packed = {
        "w1big": w1big, "b1big": b1big, "w2big": w2big, "b2big": b2big,
        "fcw": fcw, "fcb": fcb,
        "ln_g": np.asarray(p["ln_g"])[None, :], "ln_b": np.asarray(p["ln_b"])[None, :],
        "qw1f": qw1f, "qw1a": qw1a, "qb1": qb1,
        "qw2": qw2, "qb2": qb2, "qw3": qw3, "qb3": qb3,
    }
    return {k: jnp.asarray(v, jnp.float32) for k, v in packed.items()}


# ---------------------------- pure-JAX reference -----------------------------

def reference_forward(params, obs, action):
    p = {k: jnp.asarray(v) for k, v in params.items()}
    dn = ("NCHW", "OIHW", "NCHW")
    x = obs.astype(jnp.float32) / 255.0
    h = lax.conv_general_dilated(x, p["conv1_w"], (2, 2), "VALID", dimension_numbers=dn)
    h = jnp.maximum(h + p["conv1_b"][None, :, None, None], 0.0)
    h = lax.conv_general_dilated(h, p["conv2_w"], (1, 1), "VALID", dimension_numbers=dn)
    h = jnp.maximum(h + p["conv2_b"][None, :, None, None], 0.0)
    h = h.reshape(h.shape[0], -1)
    y = h @ p["fc_w"].T + p["fc_b"]
    mu = jnp.mean(y, axis=-1, keepdims=True)
    var = jnp.mean((y - mu) ** 2, axis=-1, keepdims=True)
    feat = (y - mu) * lax.rsqrt(var + 1e-5) * p["ln_g"] + p["ln_b"]
    qin = jnp.concatenate([feat, action.astype(jnp.float32)], axis=1)

    def qf(pre):
        hh = jnp.maximum(qin @ p[pre + "_w1"].T + p[pre + "_b1"], 0.0)
        hh = jnp.maximum(hh @ p[pre + "_w2"].T + p[pre + "_b2"], 0.0)
        return hh @ p[pre + "_w3"].T + p[pre + "_b3"]

    return qf("q1"), qf("q2")


# ----------------------------------- main ------------------------------------

if __name__ == "__main__":
    # obs_shape=(4,16,16), action_dim=6, hidden_dim=32, feature_dim=32,
    # num_layers=2, num_filters=8, batch=2.
    B, C, H, W = 2, 4, 16, 16
    A, HID, FEAT, NF = 6, 32, 32, 8

    key = jax.random.PRNGKey(0)
    k_obs, k_act = jax.random.split(key)
    obs = jax.random.uniform(k_obs, (B, C, H, W), jnp.float32, 0.0, 255.0)
    action = jax.random.uniform(k_act, (B, A), jnp.float32, -1.0, 1.0)

    params = init_params((C, H, W), A, HID, FEAT, NF)
    packed = prepack_params(params, (C, H, W))

    q1, q2 = jax.jit(critic_forward)(packed, obs, action)
    jax.block_until_ready((q1, q2))

    assert q1.shape == (B, 1) and q2.shape == (B, 1)
    assert q1.dtype == jnp.float32 and q2.dtype == jnp.float32
    assert bool(jnp.all(jnp.isfinite(q1))) and bool(jnp.all(jnp.isfinite(q2)))

    # numerical check against a pure-JAX reference of the PyTorch module
    r1, r2 = reference_forward(params, obs, action)
    err = max(float(jnp.max(jnp.abs(q1 - r1))), float(jnp.max(jnp.abs(q2 - r2))))
    assert err < 2e-3, f"kernel vs reference mismatch: max abs err {err}"

    print("KERNEL_OK")
</pallas_src>

<mosaic_0001>
module attributes {stable_mosaic.version = 11 : i64} {
  func.func @_critic_kernel(%arg0: memref<14x192xf32, #tpu.memory_space<vmem>>, %arg1: memref<2x6xf32, #tpu.memory_space<vmem>>, %arg2: memref<192x56xf32, #tpu.memory_space<vmem>>, %arg3: memref<1x56xf32, #tpu.memory_space<vmem>>, %arg4: memref<168x40xf32, #tpu.memory_space<vmem>>, %arg5: memref<1x40xf32, #tpu.memory_space<vmem>>, %arg6: memref<200x32xf32, #tpu.memory_space<vmem>>, %arg7: memref<1x32xf32, #tpu.memory_space<vmem>>, %arg8: memref<1x32xf32, #tpu.memory_space<vmem>>, %arg9: memref<1x32xf32, #tpu.memory_space<vmem>>, %arg10: memref<32x64xf32, #tpu.memory_space<vmem>>, %arg11: memref<6x64xf32, #tpu.memory_space<vmem>>, %arg12: memref<1x64xf32, #tpu.memory_space<vmem>>, %arg13: memref<64x64xf32, #tpu.memory_space<vmem>>, %arg14: memref<1x64xf32, #tpu.memory_space<vmem>>, %arg15: memref<64x2xf32, #tpu.memory_space<vmem>>, %arg16: memref<1x2xf32, #tpu.memory_space<vmem>>, %arg17: memref<2x2xf32, #tpu.memory_space<vmem>>) attributes {dimension_semantics = [], scalar_prefetch = 0 : i64, scratch_operands = 0 : i64, tpu.core_type = #tpu.core_type<tc>} {
    %c0 = arith.constant 0 : index
    %c0_0 = arith.constant 0 : index
    %0 = vector.load %arg0[%c0, %c0_0] : memref<14x192xf32, #tpu.memory_space<vmem>>, vector<14x192xf32>
    %c0_1 = arith.constant 0 : index
    %c0_2 = arith.constant 0 : index
    %1 = vector.load %arg2[%c0_1, %c0_2] : memref<192x56xf32, #tpu.memory_space<vmem>>, vector<192x56xf32>
    %cst = arith.constant dense<0.000000e+00> : vector<14x56xf32>
    %2 = tpu.matmul %0, %1, %cst {dimension_numbers = #tpu.dot_dimension_numbers<[1], [0], [0], [1], [0, 0, 1, 1], [], []>} : vector<14x192xf32>, vector<192x56xf32>, vector<14x56xf32> -> vector<14x56xf32>
    %c0_3 = arith.constant 0 : index
    %c0_4 = arith.constant 0 : index
    %3 = vector.load %arg3[%c0_3, %c0_4] : memref<1x56xf32, #tpu.memory_space<vmem>>, vector<1x56xf32>
    %4 = vector.broadcast %3 : vector<1x56xf32> to vector<14x56xf32>
    %5 = arith.addf %2, %4 : vector<14x56xf32>
    %cst_5 = arith.constant 0.000000e+00 : f32
    %6 = vector.broadcast %cst_5 : f32 to vector<14x56xf32>
    %7 = arith.maximumf %5, %6 : vector<14x56xf32>
    %8 = vector.extract_strided_slice %7 {offsets = [0, 0], sizes = [10, 56], strides = [1, 1]} : vector<14x56xf32> to vector<10x56xf32>
    %9 = vector.extract_strided_slice %7 {offsets = [2, 0], sizes = [10, 56], strides = [1, 1]} : vector<14x56xf32> to vector<10x56xf32>
    %10 = vector.extract_strided_slice %7 {offsets = [4, 0], sizes = [10, 56], strides = [1, 1]} : vector<14x56xf32> to vector<10x56xf32>
    %11 = tpu.concatenate %8, %9, %10 in 1 : vector<10x56xf32>, vector<10x56xf32>, vector<10x56xf32> -> vector<10x168xf32>
    %c0_6 = arith.constant 0 : index
    %c0_7 = arith.constant 0 : index
    %12 = vector.load %arg4[%c0_6, %c0_7] : memref<168x40xf32, #tpu.memory_space<vmem>>, vector<168x40xf32>
    %cst_8 = arith.constant dense<0.000000e+00> : vector<10x40xf32>
    %13 = tpu.matmul %11, %12, %cst_8 {dimension_numbers = #tpu.dot_dimension_numbers<[1], [0], [0], [1], [0, 0, 1, 1], [], []>} : vector<10x168xf32>, vector<168x40xf32>, vector<10x40xf32> -> vector<10x40xf32>
    %c0_9 = arith.constant 0 : index
    %c0_10 = arith.constant 0 : index
    %14 = vector.load %arg5[%c0_9, %c0_10] : memref<1x40xf32, #tpu.memory_space<vmem>>, vector<1x40xf32>
    %15 = vector.broadcast %14 : vector<1x40xf32> to vector<10x40xf32>
    %16 = arith.addf %13, %15 : vector<10x40xf32>
    %cst_11 = arith.constant 0.000000e+00 : f32
    %17 = vector.broadcast %cst_11 : f32 to vector<10x40xf32>
    %18 = arith.maximumf %16, %17 : vector<10x40xf32>
    %19 = vector.extract_strided_slice %18 {offsets = [0, 0], sizes = [2, 40], strides = [1, 1]} : vector<10x40xf32> to vector<2x40xf32>
    %20 = vector.extract_strided_slice %18 {offsets = [2, 0], sizes = [2, 40], strides = [1, 1]} : vector<10x40xf32> to vector<2x40xf32>
    %21 = vector.extract_strided_slice %18 {offsets = [4, 0], sizes = [2, 40], strides = [1, 1]} : vector<10x40xf32> to vector<2x40xf32>
    %22 = vector.extract_strided_slice %18 {offsets = [6, 0], sizes = [2, 40], strides = [1, 1]} : vector<10x40xf32> to vector<2x40xf32>
    %23 = vector.extract_strided_slice %18 {offsets = [8, 0], sizes = [2, 40], strides = [1, 1]} : vector<10x40xf32> to vector<2x40xf32>
    %24 = tpu.concatenate %19, %20, %21, %22, %23 in 1 : vector<2x40xf32>, vector<2x40xf32>, vector<2x40xf32>, vector<2x40xf32>, vector<2x40xf32> -> vector<2x200xf32>
    %c0_12 = arith.constant 0 : index
    %c0_13 = arith.constant 0 : index
    %25 = vector.load %arg6[%c0_12, %c0_13] : memref<200x32xf32, #tpu.memory_space<vmem>>, vector<200x32xf32>
    %cst_14 = arith.constant dense<0.000000e+00> : vector<2x32xf32>
    %26 = tpu.matmul %24, %25, %cst_14 {dimension_numbers = #tpu.dot_dimension_numbers<[1], [0], [0], [1], [0, 0, 1, 1], [], []>} : vector<2x200xf32>, vector<200x32xf32>, vector<2x32xf32> -> vector<2x32xf32>
    %c0_15 = arith.constant 0 : index
    %c0_16 = arith.constant 0 : index
    %27 = vector.load %arg7[%c0_15, %c0_16] : memref<1x32xf32, #tpu.memory_space<vmem>>, vector<1x32xf32>
    %28 = vector.broadcast %27 : vector<1x32xf32> to vector<2x32xf32>
    %29 = arith.addf %26, %28 : vector<2x32xf32>
    %cst_17 = arith.constant dense<0.000000e+00> : vector<2xf32>
    %30 = vector.multi_reduction <add>, %29, %cst_17 [1] : vector<2x32xf32> to vector<2xf32>
    %31 = vector.shape_cast %30 : vector<2xf32> to vector<2x1xf32>
    %cst_18 = arith.constant 3.200000e+01 : f32
    %32 = vector.broadcast %cst_18 : f32 to vector<2x1xf32>
    %33 = arith.divf %31, %32 : vector<2x1xf32>
    %34 = vector.broadcast %33 : vector<2x1xf32> to vector<2x32xf32>
    %35 = arith.subf %29, %34 : vector<2x32xf32>
    %36 = arith.mulf %35, %35 : vector<2x32xf32>
    %cst_19 = arith.constant dense<0.000000e+00> : vector<2xf32>
    %37 = vector.multi_reduction <add>, %36, %cst_19 [1] : vector<2x32xf32> to vector<2xf32>
    %38 = vector.shape_cast %37 : vector<2xf32> to vector<2x1xf32>
    %cst_20 = arith.constant 3.200000e+01 : f32
    %39 = vector.broadcast %cst_20 : f32 to vector<2x1xf32>
    %40 = arith.divf %38, %39 : vector<2x1xf32>
    %41 = vector.broadcast %33 : vector<2x1xf32> to vector<2x32xf32>
    %42 = arith.subf %29, %41 : vector<2x32xf32>
    %cst_21 = arith.constant 9.99999974E-6 : f32
    %43 = vector.broadcast %cst_21 : f32 to vector<2x1xf32>
    %44 = arith.addf %40, %43 : vector<2x1xf32>
    %45 = math.rsqrt %44 : vector<2x1xf32>
    %46 = vector.broadcast %45 : vector<2x1xf32> to vector<2x32xf32>
    %47 = arith.mulf %42, %46 : vector<2x32xf32>
    %c0_22 = arith.constant 0 : index
    %c0_23 = arith.constant 0 : index
    %48 = vector.load %arg8[%c0_22, %c0_23] : memref<1x32xf32, #tpu.memory_space<vmem>>, vector<1x32xf32>
    %49 = vector.broadcast %48 : vector<1x32xf32> to vector<2x32xf32>
    %50 = arith.mulf %47, %49 : vector<2x32xf32>
    %c0_24 = arith.constant 0 : index
    %c0_25 = arith.constant 0 : index
    %51 = vector.load %arg9[%c0_24, %c0_25] : memref<1x32xf32, #tpu.memory_space<vmem>>, vector<1x32xf32>
    %52 = vector.broadcast %51 : vector<1x32xf32> to vector<2x32xf32>
    %53 = arith.addf %50, %52 : vector<2x32xf32>
    %c0_26 = arith.constant 0 : index
    %c0_27 = arith.constant 0 : index
    %54 = vector.load %arg10[%c0_26, %c0_27] : memref<32x64xf32, #tpu.memory_space<vmem>>, vector<32x64xf32>
    %cst_28 = arith.constant dense<0.000000e+00> : vector<2x64xf32>
    %55 = tpu.matmul %53, %54, %cst_28 {dimension_numbers = #tpu.dot_dimension_numbers<[1], [0], [0], [1], [0, 0, 1, 1], [], []>} : vector<2x32xf32>, vector<32x64xf32>, vector<2x64xf32> -> vector<2x64xf32>
    %c0_29 = arith.constant 0 : index
    %c0_30 = arith.constant 0 : index
    %56 = vector.load %arg1[%c0_29, %c0_30] : memref<2x6xf32, #tpu.memory_space<vmem>>, vector<2x6xf32>
    %c0_31 = arith.constant 0 : index
    %c0_32 = arith.constant 0 : index
    %57 = vector.load %arg11[%c0_31, %c0_32] : memref<6x64xf32, #tpu.memory_space<vmem>>, vector<6x64xf32>
    %cst_33 = arith.constant dense<0.000000e+00> : vector<2x64xf32>
    %58 = tpu.matmul %56, %57, %cst_33 {dimension_numbers = #tpu.dot_dimension_numbers<[1], [0], [0], [1], [0, 0, 1, 1], [], []>} : vector<2x6xf32>, vector<6x64xf32>, vector<2x64xf32> -> vector<2x64xf32>
    %59 = arith.addf %55, %58 : vector<2x64xf32>
    %c0_34 = arith.constant 0 : index
    %c0_35 = arith.constant 0 : index
    %60 = vector.load %arg12[%c0_34, %c0_35] : memref<1x64xf32, #tpu.memory_space<vmem>>, vector<1x64xf32>
    %61 = vector.broadcast %60 : vector<1x64xf32> to vector<2x64xf32>
    %62 = arith.addf %59, %61 : vector<2x64xf32>
    %cst_36 = arith.constant 0.000000e+00 : f32
    %63 = vector.broadcast %cst_36 : f32 to vector<2x64xf32>
    %64 = arith.maximumf %62, %63 : vector<2x64xf32>
    %c0_37 = arith.constant 0 : index
    %c0_38 = arith.constant 0 : index
    %65 = vector.load %arg13[%c0_37, %c0_38] : memref<64x64xf32, #tpu.memory_space<vmem>>, vector<64x64xf32>
    %cst_39 = arith.constant dense<0.000000e+00> : vector<2x64xf32>
    %66 = tpu.matmul %64, %65, %cst_39 {dimension_numbers = #tpu.dot_dimension_numbers<[1], [0], [0], [1], [0, 0, 1, 1], [], []>} : vector<2x64xf32>, vector<64x64xf32>, vector<2x64xf32> -> vector<2x64xf32>
    %c0_40 = arith.constant 0 : index
    %c0_41 = arith.constant 0 : index
    %67 = vector.load %arg14[%c0_40, %c0_41] : memref<1x64xf32, #tpu.memory_space<vmem>>, vector<1x64xf32>
    %68 = vector.broadcast %67 : vector<1x64xf32> to vector<2x64xf32>
    %69 = arith.addf %66, %68 : vector<2x64xf32>
    %cst_42 = arith.constant 0.000000e+00 : f32
    %70 = vector.broadcast %cst_42 : f32 to vector<2x64xf32>
    %71 = arith.maximumf %69, %70 : vector<2x64xf32>
    %c0_43 = arith.constant 0 : index
    %c0_44 = arith.constant 0 : index
    %72 = vector.load %arg15[%c0_43, %c0_44] : memref<64x2xf32, #tpu.memory_space<vmem>>, vector<64x2xf32>
    %cst_45 = arith.constant dense<0.000000e+00> : vector<2x2xf32>
    %73 = tpu.matmul %71, %72, %cst_45 {dimension_numbers = #tpu.dot_dimension_numbers<[1], [0], [0], [1], [0, 0, 1, 1], [], []>} : vector<2x64xf32>, vector<64x2xf32>, vector<2x2xf32> -> vector<2x2xf32>
    %c0_46 = arith.constant 0 : index
    %c0_47 = arith.constant 0 : index
    %74 = vector.load %arg16[%c0_46, %c0_47] : memref<1x2xf32, #tpu.memory_space<vmem>>, vector<1x2xf32>
    %75 = vector.broadcast %74 : vector<1x2xf32> to vector<2x2xf32>
    %76 = arith.addf %73, %75 : vector<2x2xf32>
    %c0_48 = arith.constant 0 : index
    %c0_49 = arith.constant 0 : index
    %77 = vector.load %arg17[%c0_48, %c0_49] : memref<2x2xf32, #tpu.memory_space<vmem>>, vector<2x2xf32>
    tpu.vector_store %arg17[%c0_48, %c0_49], %76 {strides = array<i32>} : memref<2x2xf32, #tpu.memory_space<vmem>>, vector<2x2xf32>,
    return
  }
}

</mosaic_0001>

<bundles_post_ra>
// kernel: critic_forward.1
= control target key start
LH: loop header
LB: loop body
LE: loop exit
PB: predicated region body
PF: predicated region fallthrough
CT: control target
= control target key end

     0   :  { %vm88_vm0 = vcmask 523264   ;;  %vm145_vm1 = vcmask 1045504   ;;  %s554_s18 = smov 56   ;;  %vm155_vm2 = vcmask 1043456   ;;  %vm165_vm3 = vcmask 457728   ;;  %s557_s30 = smov 40   ;;  %s985_s2 = inlined_call_operand.vmem [shape: f32[192,56], index: 2, kind: input, shape index: {}]   ;;  %s986_s3 = inlined_call_operand.vmem [shape: f32[1,56], index: 3, kind: input, shape index: {}]   ;;  %s987_s0 = inlined_call_operand.vmem [shape: f32[14,192], index: 0, kind: input, shape index: {}]   ;;  %s988_s4 = inlined_call_operand.vmem [shape: f32[168,40], index: 4, kind: input, shape index: {}]   ;;  %s989_s5 = inlined_call_operand.vmem [shape: f32[1,40], index: 5, kind: input, shape index: {}]   ;;  %s990_s6 = inlined_call_operand.vmem [shape: f32[200,32], index: 6, kind: input, shape index: {}]   ;;  %s991_s7 = inlined_call_operand.vmem [shape: f32[1,32], index: 7, kind: input, shape index: {}]   ;;  %s992_s8 = inlined_call_operand.vmem [shape: f32[1,32], index: 8, kind: input, shape index: {}]   ;;  %s993_s9 = inlined_call_operand.vmem [shape: f32[1,32], index: 9, kind: input, shape index: {}]   ;;  %s994_s10 = inlined_call_operand.vmem [shape: f32[32,64], index: 10, kind: input, shape index: {}]   ;;  %s995_s11 = inlined_call_operand.vmem [shape: f32[6,64], index: 11, kind: input, shape index: {}]   ;;  %s996_s1 = inlined_call_operand.vmem [shape: f32[2,6], index: 1, kind: input, shape index: {}]   ;;  %s997_s13 = inlined_call_operand.vmem [shape: f32[64,64], index: 13, kind: input, shape index: {}]   ;;  %s998_s12 = inlined_call_operand.vmem [shape: f32[1,64], index: 12, kind: input, shape index: {}]   ;;  %s999_s14 = inlined_call_operand.vmem [shape: f32[1,64], index: 14, kind: input, shape index: {}]   ;;  %s1000_s15 = inlined_call_operand.vmem [shape: f32[64,2], index: 15, kind: input, shape index: {}]   ;;  %s1001_s16 = inlined_call_operand.vmem [shape: f32[1,2], index: 16, kind: input, shape index: {}]   ;;  %s1002_s17 = inlined_call_operand.vmem [shape: f32[2,2], index: 17, kind: output, shape index: {}]  }
   0x1   :  { %1004 = sst [smem:[#allocation2_spill]] %s985_s2  ;;  %v57_v18 = vld [vmem:[%s987_s0 + $0x8] sm:$0xff]  ;;  %v59_v23 = vld [vmem:[%s987_s0 + $0x18] sm:$0x3f]  ;;  %v56_v26 = vld [vmem:[%s987_s0] sm:$0xff]  ;;  %vm196_vm4 = vcmask 326656  }
   0x2   :  { %1005 = sst [smem:[#allocation3_spill]] %s986_s3  ;;  %v58_v27 = vld [vmem:[%s987_s0 + $0x10] sm:$0x3f]  ;;  %v186_v28 = vld [vmem:[%s988_s4 + $0x78] sm:$0xff]  ;;  %v184_v30 = vld [vmem:[%s988_s4 + $0x68] sm:$0xff]  ;;  %vm168_vm5 = vcmask 916480  }
   0x3   :  { %s1006_s26 = sld [smem:[#allocation2_spill]]  ;;  %v185_v29 = vld [vmem:[%s988_s4 + $0x70] sm:$0xff]  ;;  %201 = vmatpush.msra.mxu2 %v186_v28  ;;  %v183_v32 = vld [vmem:[%s988_s4 + $0x60] sm:$0xff]  ;;  %v182_v35 = vld [vmem:[%s988_s4 + $0x58] sm:$0xff]  ;;  %s556_s2 = smov 120   ;;  %vm267_vm6 = vcmask 654336  }
   0x4   :  { %s1007_s19 = sld [smem:[#allocation3_spill]]  ;;  %v181_v36 = vld [vmem:[%s988_s4 + $0x50] sm:$0xff]  ;;  %v180_v38 = vld [vmem:[%s988_s4 + $0x48] sm:$0xff]  ;;  %v179_v39 = vld [vmem:[%s988_s4 + $0x40] sm:$0xff]  ;;  %s559_s0 = smov 80   ;;  %vm269_vm7 = vcmask 982016  }
   0x5   :  { %202 = vmatpush.msra.mxu2 %v185_v29  ;;  %v178_v43 = vld [vmem:[%s988_s4 + $0x38] sm:$0xff]  ;;  %v177_v45 = vld [vmem:[%s988_s4 + $0x30] sm:$0xff]  ;;  %v176_v48 = vld [vmem:[%s988_s4 + $0x28] sm:$0xff]  ;;  %vm271_vm8 = vcmask 261120   ;;  %vm302_vm9 = vcmask 588800   ;;  %vm346_vm10 = vcmask 254976  }
   0x6   :  { %v191_v56 = vld [vmem:[%s988_s4 + $0xa0] sm:$0xff]  ;;  %v190_v58 = vld [vmem:[%s988_s4 + $0x98] sm:$0xff]  ;;  %v189_v60 = vld [vmem:[%s988_s4 + $0x90] sm:$0xff]  ;;  %vm392_vm12 = vcmask 48128  }
   0x7   :  { %203 = vmatpush.msra.mxu2 %v184_v30  ;;  %235 = vmatpush.msra.mxu3 %v191_v56  ;;  %v175_v57 = vld [vmem:[%s988_s4 + $0x20] sm:$0xff]  ;;  %v174_v59 = vld [vmem:[%s988_s4 + $0x18] sm:$0xff]  ;;  %v173_v61 = vld [vmem:[%s988_s4 + $0x10] sm:$0xff] }
   0x8   :  { %v188_v62 = vld [vmem:[%s988_s4 + $0x88] sm:$0xff]  ;;  %v284_v28 = vld [vmem:[%s990_s6 + $0x58] sm:$0xff]  ;;  %v283_v29 = vld [vmem:[%s990_s6 + $0x50] sm:$0xff] }
   0x9   :  { %v75_v0 = vld [vmem:[%s1006_s26 + $0x78] sm:$0xff]  ;;  %v74_v1 = vld [vmem:[%s1006_s26 + $0x70] sm:$0xff]  ;;  %v73_v2 = vld [vmem:[%s1006_s26 + $0x68] sm:$0xff]  ;;  %204 = vmatpush.msra.mxu2 %v183_v32  ;;  %236 = vmatpush.msra.mxu3 %v190_v58 }
   0xa   :  { %95 = vmatpush.msra.mxu0 %v75_v0  ;;  %v83_v3 = vld [vmem:[%s1006_s26 + $0xb8] sm:$0xff]  ;;  %v72_v4 = vld [vmem:[%s1006_s26 + $0x60] sm:$0xff]  ;;  %v82_v5 = vld [vmem:[%s1006_s26 + $0xb0] sm:$0xff] }
   0xb   :  { %126 = vmatpush.msra.mxu1 %v83_v3  ;;  %v81_v6 = vld [vmem:[%s1006_s26 + $0xa8] sm:$0xff]  ;;  %v71_v7 = vld [vmem:[%s1006_s26 + $0x58] sm:$0xff]  ;;  %v80_v8 = vld [vmem:[%s1006_s26 + $0xa0] sm:$0xff]  ;;  %205 = vmatpush.msra.mxu2 %v182_v35 }
   0xc   :  { %96 = vmatpush.msra.mxu0 %v74_v1  ;;  %v70_v9 = vld [vmem:[%s1006_s26 + $0x50] sm:$0xff]  ;;  %v79_v10 = vld [vmem:[%s1006_s26 + $0x98] sm:$0xff]  ;;  %v69_v11 = vld [vmem:[%s1006_s26 + $0x48] sm:$0xff]  ;;  %237 = vmatpush.msra.mxu3 %v189_v60 }
   0xd   :  { %127 = vmatpush.msra.mxu1 %v82_v5  ;;  %v78_v12 = vld [vmem:[%s1006_s26 + $0x90] sm:$0xff]  ;;  %v68_v13 = vld [vmem:[%s1006_s26 + $0x40] sm:$0xff]  ;;  %v77_v14 = vld [vmem:[%s1006_s26 + $0x88] sm:$0xff]  ;;  %206 = vmatpush.msra.mxu2 %v181_v36 }
   0xe   :  { %97 = vmatpush.msra.mxu0 %v73_v2  ;;  %v67_v15 = vld [vmem:[%s1006_s26 + $0x38] sm:$0xff]  ;;  %v76_v16 = vld [vmem:[%s1006_s26 + $0x80] sm:$0xff]  ;;  %v66_v17 = vld [vmem:[%s1006_s26 + $0x30] sm:$0xff]  ;;  %238 = vmatpush.msra.mxu3 %v188_v62 }
   0xf   :  { %128 = vmatpush.msra.mxu1 %v81_v6  ;;  %v65_v19 = vld [vmem:[%s1006_s26 + $0x28] sm:$0xff]  ;;  %v64_v20 = vld [vmem:[%s1006_s26 + $0x20] sm:$0xff]  ;;  %v63_v21 = vld [vmem:[%s1006_s26 + $0x18] sm:$0xff]  ;;  %207 = vmatpush.msra.mxu2 %v180_v38 }
  0x10   :  { %98 = vmatpush.msra.mxu0 %v72_v4  ;;  %v62_v22 = vld [vmem:[%s1006_s26 + $0x10] sm:$0xff]  ;;  %v61_v24 = vld [vmem:[%s1006_s26 + $0x8] sm:$0xff]  ;;  %v60_v25 = vld [vmem:[%s1006_s26] sm:$0xff] }
  0x11   :  { %129 = vmatpush.msra.mxu1 %v80_v8  ;;  %v542_v33 = vld [vmem:[%s1007_s19] ss:$0 sm:$0xff]  ;;  %208 = vmatpush.msra.mxu2 %v179_v39  ;;  %s555_s19 = smov 112   ;;  %v172_v63 = vld [vmem:[%s988_s4 + $0x8] sm:$0xff]  ;;  %v280_v32 = vld [vmem:[%s990_s6 + $0x38] sm:$0xff] }
  0x12   :  { %99 = vmatpush.msra.mxu0 %v71_v7  ;;  %v187_v0 = vld [vmem:[%s988_s4 + $0x80] sm:$0xff]  ;;  %v282_v30 = vld [vmem:[%s990_s6 + $0x48] sm:$0xff]  ;;  %v296_v35 = vld [vmem:[%s990_s6 + $0xb8] sm:$0xff] }
  0x13   :  { %130 = vmatpush.msra.mxu1 %v79_v10  ;;  %209 = vmatpush.msra.mxu2 %v178_v43  ;;  %v171_v1 = vld [vmem:[%s988_s4] sm:$0xff]  ;;  %v288_v10 = vld [vmem:[%s990_s6 + $0x78] sm:$0xff]  ;;  %v278_v36 = vld [vmem:[%s990_s6 + $0x28] sm:$0xff] }
  0x14   :  { %100 = vmatpush.msra.mxu0 %v70_v9  ;;  %239 = vmatpush.msra.mxu3 %v187_v0  ;;  %v277_v38 = vld [vmem:[%s990_s6 + $0x20] sm:$0xff]  ;;  %v294_v39 = vld [vmem:[%s990_s6 + $0xa8] sm:$0xff] }
  0x15   :  { %131 = vmatpush.msra.mxu1 %v78_v12  ;;  %210 = vmatpush.msra.mxu2 %v177_v45  ;;  %v286_v12 = vld [vmem:[%s990_s6 + $0x68] sm:$0xff]  ;;  %v292_v45 = vld [vmem:[%s990_s6 + $0x98] sm:$0xff] }
  0x16   :  { %101 = vmatpush.msra.mxu0 %v69_v11  ;;  %v287_v11 = vld [vmem:[%s990_s6 + $0x70] sm:$0xff]  ;;  %306 = vmatpush.msrb.mxu3 %v288_v10  ;;  %v274_v43 = vld [vmem:[%s990_s6 + $0x8] sm:$0xff] }
  0x17   :  { %132 = vmatpush.msra.mxu1 %v77_v14  ;;  %211 = vmatpush.msra.mxu2 %v176_v48  ;;  %v289_v48 = vld [vmem:[%s990_s6 + $0x80] sm:$0xff] }
  0x18   :  { %102 = vmatpush.msra.mxu0 %v68_v13  ;;  %307 = vmatpush.msrb.mxu3 %v287_v11  ;;  %v543_v13 = vld [vmem:[%s989_s5] ss:$0 sm:$0xff]  ;;  %s558_s5 = smov 32   ;;  %v389_v11 = vld [vmem:[%s994_s10 + $0x18] sm:$0xff] }
  0x19   :  { %133 = vmatpush.msra.mxu1 %v76_v16  ;;  %212 = vmatpush.msra.mxu2 %v175_v57  ;;  %v544_v57 = vld [vmem:[%s991_s7] ss:$0 sm:$0xff] }
  0x1a   :  { %103 = vmatpush.msra.mxu0 %v67_v15  ;;  %525 = vmatmul.msk.f32.vlgmr.msra.gmra.mxu1 %vm88_vm0, %v57_v18 }
  0x1b   :  { %213 = vmatpush.msra.mxu2 %v174_v59  ;;  %308 = vmatpush.msrb.mxu3 %v286_v12  ;;  %v391_v12 = vld [vmem:[%s995_s11] sm:$0x3f] }
  0x1c   :  { %104 = vmatpush.msra.mxu0 %v66_v17 }
  0x1d   :  { %214 = vmatpush.msra.mxu2 %v173_v61 }
  0x1e   :  { %105 = vmatpush.msra.mxu0 %v65_v19 }
  0x1f   :  { %215 = vmatpush.msra.mxu2 %v172_v63  ;;  %v560_v63 = vmov 32.0  }
  0x20   :  { %106 = vmatpush.msra.mxu0 %v64_v20  ;;  %550 = vrcp.f32 %v560_v63 }
  0x21   :  { %216 = vmatpush.msra.mxu2 %v171_v1 }
  0x22   :  { %107 = vmatpush.msra.mxu0 %v63_v21  ;;  %526 = vmatmul.msk.f32.gmra.mxu1 %vm88_vm0, %v59_v23 }
  0x24   :  { %108 = vmatpush.msra.mxu0 %v62_v22 }
  0x26   :  { %109 = vmatpush.msra.mxu0 %v61_v24  ;;  %v551_v0 = vpop.eup %550 }
  0x27   :  { %v351_v1 = vmul.f32 32.0, %v551_v0  ;;  %vm355_vm11 = vweird.f32 %v551_v0 }
  0x28   :  { %110 = vmatpush.msra.mxu0 %v60_v25 }
  0x29   :  { %111 = vmatmul.f32.vlgmr.msra.gmra.mxu0 %v56_v26 }
  0x2a   :  { %434 = vmatpush.msrb.mxu0 %v389_v11 }
  0x31   :  { %114 = vmatmul.f32.gmra.mxu0 %v58_v27  ;;  %v285_v27 = vld [vmem:[%s990_s6 + $0x60] sm:$0xff] }
  0x32   :  { %309 = vmatpush.msrb.mxu3 %v285_v27 }
  0x34   :  { %310 = vmatpush.msrb.mxu3 %v284_v28 }
  0x36   :  { %311 = vmatpush.msrb.mxu3 %v283_v29 }
  0x38   :  { %312 = vmatpush.msrb.mxu3 %v282_v30 }
  0x97   :  { %v135_v31 = vpop.f32.mrf.mxu1 }
  0x9f   :  { %v138_v42 = vpop.f32.mrf.mxu1 }
  0xa6   :  { %v112_v34 = vpop.f32.mrf.mxu0 }
  0xa7   :  { %v113_v37 = vadd.f32 %v542_v33, %v112_v34  ;;  %v297_v34 = vld [vmem:[%s990_s6 + $0xc0] sm:$0xff] }
  0xa8   :  { %333 = vmatpush.msrb.mxu1 %v297_v34  ;;  %v546_v34 = vld [vmem:[%s993_s9] ss:$0 sm:$0xff] }
  0xa9   :  { %v136_v40 = vadd.f32 %v135_v31, %v113_v37  ;;  %v281_v31 = vld [vmem:[%s990_s6 + $0x40] sm:$0xff]  ;;  %v295_v37 = vld [vmem:[%s990_s6 + $0xb0] sm:$0xff] }
  0xaa   :  { %313 = vmatpush.msrb.mxu3 %v281_v31  ;;  %334 = vmatpush.msrb.mxu1 %v296_v35  ;;  %v545_v31 = vld [vmem:[%s992_s8] ss:$0 sm:$0xff] }
  0xab   :  { %v141_v46 = vmax.f32 %v136_v40, 0.0  ;;  %v276_v40 = vld [vmem:[%s990_s6 + $0x18] sm:$0xff] }
  0xac   :  { %314 = vmatpush.msrb.mxu3 %v280_v32  ;;  %335 = vmatpush.msrb.mxu1 %v295_v37  ;;  %v450_v37 = vld [vmem:[%s997_s13 + $0x10] sm:$0xff] }
  0xad   :  { %v146_v51 = vrot.slane %v141_v46, 2  ;;  %v156_v54 = vrot.slane %v141_v46, 4 }
  0xae   :  { %v115_v41 = vpop.f32.mrf.mxu0  ;;  %336 = vmatpush.msrb.mxu1 %v294_v39  ;;  %v448_v39 = vld [vmem:[%s997_s13] sm:$0xff] }
  0xaf   :  { %v116_v44 = vadd.f32 %v542_v33, %v115_v41  ;;  %v279_v33 = vld [vmem:[%s990_s6 + $0x30] sm:$0xff]  ;;  %v293_v41 = vld [vmem:[%s990_s6 + $0xa0] sm:$0xff] }
  0xb0   :  { %315 = vmatpush.msrb.mxu3 %v279_v33  ;;  %337 = vmatpush.msrb.mxu1 %v293_v41  ;;  %v490_v41 = vld [vmem:[%s1000_s15 + $0x30] sm:$0xff] }
  0xb1   :  { %v139_v47 = vadd.f32 %v138_v42, %v116_v44  ;;  %v275_v42 = vld [vmem:[%s990_s6 + $0x10] sm:$0xff]  ;;  %v273_v44 = vld [vmem:[%s990_s6] sm:$0xff] }
  0xb2   :  { %316 = vmatpush.msrb.mxu3 %v278_v36  ;;  %338 = vmatpush.msrb.mxu1 %v292_v45 }
  0xb3   :  { %v142_v49 = vmax.f32 %v139_v47, 0.0  ;;  %v290_v47 = vld [vmem:[%s990_s6 + $0x88] sm:$0xff] }
  0xb4   :  { %317 = vmatpush.msrb.mxu3 %v277_v38  ;;  %v449_v38 = vld [vmem:[%s997_s13 + $0x8] sm:$0xff] }
  0xb5   :  { %v147_v50 = vrot.slane %v142_v49, 2  ;;  %v157_v53 = vrot.slane %v142_v49, 4 }
  0xb6   :  { %318 = vmatpush.msrb.mxu3 %v276_v40  ;;  %v491_v40 = vld [vmem:[%s1000_s15 + $0x38] sm:$0xff] }
  0xb7   :  { %151 = vrot.lane.b32.xlu1 %v147_v50, %s554_s18  ;;  %v148_v52 = vsel %vm145_vm1, %v146_v51, %v147_v50  ;;  %v158_v55 = vsel %vm155_vm2, %v156_v54, %v157_v53 }
  0xb8   :  { %149 = vrot.lane.b32.xlu0 %v148_v52, %s554_s18  ;;  %319 = vmatpush.msrb.mxu3 %v275_v42  ;;  %v489_v42 = vld [vmem:[%s1000_s15 + $0x28] sm:$0xff] }
  0xba   :  { %320 = vmatpush.msrb.mxu3 %v274_v43  ;;  %v488_v43 = vld [vmem:[%s1000_s15 + $0x20] sm:$0xff] }
  0xbc   :  { %321 = vmatpush.msrb.mxu3 %v273_v44  ;;  %v487_v44 = vld [vmem:[%s1000_s15 + $0x18] sm:$0xff] }
  0xbf   :  { %161 = vrot.lane.b32.xlu1 %v157_v53, %s555_s19 }
  0xc0   :  { %159 = vrot.lane.b32.xlu0 %v158_v55, %s555_s19 }
 0x129   :  { %v152_v3 = vpop.permute.xlu1 %151 }
 0x12a   :  { %v150_v2 = vpop.permute.xlu0 %149  ;;  %v167_v8 = vsel %vm165_vm3, %v142_v49, %v152_v3 }
 0x12b   :  { %v166_v4 = vsel %vm165_vm3, %v141_v46, %v150_v2  ;;  %v291_v46 = vld [vmem:[%s990_s6 + $0x90] sm:$0xff]  ;;  %v352_v2 = vsub.f32 1.0, %v351_v1 }
 0x12c   :  { %339 = vmatpush.msrb.mxu1 %v291_v46  ;;  %v547_v46 = vld [vmem:[%s998_s12] ss:$0 sm:$0xff] }
 0x12d   :  { %v353_v3 = vmul.f32 %v551_v0, %v352_v2 }
 0x12e   :  { %340 = vmatpush.msrb.mxu1 %v290_v47 }
 0x130   :  { %341 = vmatpush.msrb.mxu1 %v289_v48 }
 0x131   :  { %v162_v7 = vpop.permute.xlu1 %161 }
 0x132   :  { %v160_v5 = vpop.permute.xlu0 %159  ;;  %v170_v9 = vsel %vm168_vm5, %v167_v8, %v162_v7  ;;  %507 = vmatpush.msra.mxu1 %v491_v40 }
 0x133   :  { %527 = vmatmul.msk.f32.vlgmr.msra.gmra.mxu3 %vm196_vm4, %v160_v5  ;;  %v169_v6 = vsel %vm168_vm5, %v166_v4, %v160_v5  ;;  %v354_v4 = vadd.f32 %v551_v0, %v353_v3 }
 0x134   :  { %217 = vmatmul.f32.vlgmr.msra.gmra.mxu2 %v169_v6  ;;  %530 = vmatpush.msk.msra.mxu3 %vm145_vm1, %v391_v12  ;;  %vm519_vm1 = vcmask 9216  }
 0x135   :  { %v356_v5 = vsel %vm355_vm11, %v551_v0, %v354_v4  ;;  %508 = vmatpush.msra.mxu1 %v490_v41 }
 0x137   :  { %509 = vmatpush.msra.mxu1 %v489_v42 }
 0x139   :  { %510 = vmatpush.msra.mxu1 %v488_v43 }
 0x13b   :  { %528 = vmatmul.msk.f32.gmra.mxu3 %vm196_vm4, %v162_v7  ;;  %511 = vmatpush.msra.mxu1 %v487_v44 }
 0x13c   :  { %220 = vmatmul.f32.gmra.mxu2 %v170_v9 }
 0x1b6   :  { %v241_v14 = vpop.f32.mrf.mxu3 }
 0x1b7   :  { %v218_v15 = vpop.f32.mrf.mxu2 }
 0x1b8   :  { %v219_v16 = vadd.f32 %v543_v13, %v218_v15  ;;  %v387_v15 = vld [vmem:[%s994_s10 + $0x8] sm:$0xff] }
 0x1ba   :  { %v242_v17 = vadd.f32 %v241_v14, %v219_v16  ;;  %v388_v14 = vld [vmem:[%s994_s10 + $0x10] sm:$0xff]  ;;  %v386_v16 = vld [vmem:[%s994_s10] sm:$0xff] }
 0x1bb   :  { %435 = vmatpush.msrb.mxu0 %v388_v14 }
 0x1bc   :  { %v818_v18 = vmax.f32 %v242_v17, 0.0  ;;  %v455_v17 = vld [vmem:[%s997_s13 + $0x38] sm:$0xff] }
 0x1bd   :  { %436 = vmatpush.msrb.mxu0 %v387_v15  ;;  %471 = vmatpush.msrb.mxu2 %v455_v17 }
 0x1be   :  { %v258_v19 = vrot.slane %v818_v18, 6  ;;  %v250_v20 = vrot.slane %v818_v18, 2  ;;  %v244_v23 = vpop.f32.mrf.mxu3  ;;  %v254_v26 = vrot.slane %v818_v18, 4 }
 0x1bf   :  { %v221_v21 = vpop.f32.mrf.mxu2  ;;  %437 = vmatpush.msrb.mxu0 %v386_v16 }
 0x1c0   :  { %v222_v22 = vadd.f32 %v543_v13, %v221_v21  ;;  %259 = vrot.lane.b32.xlu0 %v258_v19, %s556_s2  ;;  %251 = vrot.lane.b32.xlu2 %v250_v20, %s557_s30  ;;  %v390_v13 = vld [vmem:[%s996_s1] sm:$0x3]  ;;  %v453_v19 = vld [vmem:[%s997_s13 + $0x28] sm:$0xff] }
 0x1c2   :  { %v245_v24 = vadd.f32 %v244_v23, %v222_v22  ;;  %v452_v22 = vld [vmem:[%s997_s13 + $0x20] sm:$0xff] }
 0x1c4   :  { %v248_v25 = vmax.f32 %v245_v24, 0.0  ;;  %v451_v24 = vld [vmem:[%s997_s13 + $0x18] sm:$0xff] }
 0x1c6   :  { %263 = vrot.lane.b32.xlu1 %v248_v25, %s558_s5 }
 0x1c8   :  { %255 = vrot.lane.b32.xlu2 %v254_v26, %s559_s0 }
 0x21a   :  { %v252_v49 = vpop.permute.xlu2 %251 }
 0x21b   :  { %v266_v51 = vsel %vm196_vm4, %v818_v18, %v252_v49  ;;  %v454_v18 = vld [vmem:[%s997_s13 + $0x30] sm:$0xff] }
 0x21c   :  { %472 = vmatpush.msrb.mxu2 %v454_v18 }
 0x21e   :  { %473 = vmatpush.msrb.mxu2 %v453_v19 }
 0x220   :  { %474 = vmatpush.msrb.mxu2 %v452_v22 }
 0x222   :  { %v256_v50 = vpop.permute.xlu2 %255  ;;  %475 = vmatpush.msrb.mxu2 %v451_v24 }
 0x223   :  { %v268_v52 = vsel %vm267_vm6, %v266_v51, %v256_v50  ;;  %v486_v51 = vld [vmem:[%s1000_s15 + $0x10] sm:$0xff] }
 0x224   :  { %476 = vmatpush.msrb.mxu2 %v450_v37  ;;  %512 = vmatpush.msra.mxu1 %v486_v51 }
 0x226   :  { %477 = vmatpush.msrb.mxu2 %v449_v38 }
 0x228   :  { %478 = vmatpush.msrb.mxu2 %v448_v39 }
 0x232   :  { %v260_v53 = vpop.permute.xlu0 %259 }
 0x233   :  { %v270_v54 = vsel %vm269_vm7, %v268_v52, %v260_v53  ;;  %v485_v52 = vld [vmem:[%s1000_s15 + $0x8] sm:$0xff] }
 0x234   :  { %322 = vmatmul.f32.vlgmr.msrb.gmra.mxu3 %v270_v54  ;;  %513 = vmatpush.msra.mxu1 %v485_v52  ;;  %v548_v54 = vld [vmem:[%s999_s14] ss:$0 sm:$0xff] }
 0x238   :  { %v264_v55 = vpop.permute.xlu1 %263 }
 0x239   :  { %v272_v56 = vsel %vm271_vm8, %v260_v53, %v264_v55  ;;  %v484_v53 = vld [vmem:[%s1000_s15] sm:$0xff] }
 0x23a   :  { %529 = vmatmul.msk.f32.vlgmr.msrb.gmra.mxu1 %vm302_vm9, %v272_v56 }
 0x23b   :  { %514 = vmatpush.msra.mxu1 %v484_v53 }
 0x23c   :  { %531 = vmatmul.msk.f32.vlgmr.msra.gmra.mxu3 %vm392_vm12, %v390_v13 }
 0x2b7   :  { %v323_v58 = vpop.f32.mrf.mxu3  ;;  %v343_v60 = vpop.f32.mrf.mxu1 }
 0x2b8   :  { %v324_v59 = vadd.f32 %v544_v57, %v323_v58  ;;  %v549_v58 = vld [vmem:[%s1001_s16] ss:$0 sm:$0xff] }
 0x2ba   :  { %v344_v61 = vadd.f32 %v343_v60, %v324_v59 }
 0x2bc   :  { %v347_v62 = vsel %vm346_vm10, %v344_v61, 0.0 }
 0x2bd   :  { %348 = vadd.xlane.f32.xlu2 %v347_v62 }
 0x2bf   :  { %v416_v45 = vpop.f32.mrf.mxu3 }
 0x330   :  { %v349_v6 = vpop.xlane.xlu2 %348 }
 0x331   :  { %v357_v7 = vmul.f32 %v356_v5, %v349_v6 }
 0x333   :  { %v358_v8 = vsub.f32 %v344_v61, %v357_v7 }
 0x335   :  { %v359_v9 = vmul.f32 %v358_v8, %v358_v8 }
 0x337   :  { %v360_v10 = vsel %vm346_vm10, %v359_v9, 0.0 }
 0x338   :  { %361 = vadd.xlane.f32.xlu0 %v360_v10 }
 0x3ab   :  { %v362_v20 = vpop.xlane.xlu0 %361 }
 0x3ac   :  { %v363_v21 = vmul.f32 %v362_v20, %v356_v5 }
 0x3ae   :  { %v364_v23 = vadd.f32 1e-05, %v363_v21 }
 0x3b0   :  { %552 = vrsqrt.f32 %v364_v23  ;;  %vm371_vm14 = vweird.f32 %v364_v23 }
 0x3b6   :  { %v553_v25 = vpop.eup %552 }
 0x3b7   :  { %v366_v26 = vmul.f32 %v553_v25, %v364_v23  ;;  %vm372_vm13 = vweird.f32 %v553_v25 }
 0x3b8   :  { %vm373_vm15 = vmor %vm371_vm14, %vm372_vm13 }
 0x3b9   :  { %v367_v27 = vmul.f32 %v553_v25, %v366_v26 }
 0x3bb   :  { %v368_v28 = vmul.f32 0.5, %v367_v27 }
 0x3bd   :  { %v369_v29 = vsub.f32 1.5, %v368_v28 }
 0x3bf   :  { %v370_v30 = vmul.f32 %v553_v25, %v369_v29 }
 0x3c1   :  { %v374_v32 = vsel %vm373_vm15, %v553_v25, %v370_v30 }
 0x3c2   :  { %v375_v33 = vmul.f32 %v374_v32, %v358_v8 }
 0x3c4   :  { %v380_v35 = vmul.f32 %v545_v31, %v375_v33 }
 0x3c6   :  { %v385_v36 = vadd.f32 %v546_v34, %v380_v35 }
 0x3c8   :  { %532 = vmatmul.msk.f32.vlgmr.msrb.gmra.mxu0 %vm271_vm8, %v385_v36 }
 0x445   :  { %v439_v47 = vpop.f32.mrf.mxu0 }
 0x446   :  { %v440_v48 = vadd.f32 %v439_v47, %v416_v45 }
 0x448   :  { %v446_v49 = vadd.f32 %v547_v46, %v440_v48 }
 0x44a   :  { %v447_v50 = vmax.f32 %v446_v49, 0.0 }
 0x44c   :  { %533 = vmatmul.msk.f32.vlgmr.msrb.gmra.mxu2 %vm88_vm0, %v447_v50 }
 0x4cf   :  { %v480_v55 = vpop.f32.mrf.mxu2 }
 0x4d0   :  { %v481_v56 = vadd.f32 %v548_v54, %v480_v55 }
 0x4d2   :  { %v483_v57 = vmax.f32 %v481_v56, 0.0 }
 0x4d4   :  { %534 = vmatmul.msk.f32.vlgmr.msra.gmra.mxu1 %vm88_vm0, %v483_v57 }
 0x551   :  { %v516_v59 = vpop.f32.mrf.mxu1 }
 0x552   :  { %v517_v60 = vadd.f32 %v549_v58, %v516_v59 }
 0x554   :  { %520 = vst.msk [vmem:[%s1002_s17] sm:$0x3] %vm519_vm1, %v517_v60 }

</bundles_post_ra>
